<compile_context>
chip_gen: v5e
topology: v5e:2x2
jax: 0.10.0
libtpu: 0.0.40
codegen_flags: <defaults>
</compile_context>

<pallas_src>
import functools

import jax
import jax.numpy as jnp
from jax.experimental import pallas as pl
from jax.experimental.pallas import tpu as pltpu

EPS = 1e-5        # PyTorch nn.LayerNorm default eps
_LANES = 128
_SUBLANES = 8


def _round_up(x, m):
    return (x + m - 1) // m * m


def _device_vmem_bytes(default=64 << 20):
    """Per-core VMEM capacity; conservative 64 MiB (v7x) fallback if unqueryable."""
    try:
        info = pltpu.get_tpu_info()
        return int(getattr(info, "vmem_capacity_bytes", default))
    except Exception:
        return default


def _layernorm(h, gamma, beta, mask, inv_n):
    """LayerNorm over lanes (biased variance, matches nn.LayerNorm).

    `h` may be lane-padded beyond n_hidden; padded lanes hold exact zeros on input,
    so sum(h) * inv_n is already the correct mean.  `mask` (1/0 f32 row) re-zeroes
    padded lanes after centering; pass None when the block is not lane-padded.
    """
    mean = jnp.sum(h, axis=-1, keepdims=True) * inv_n
    centered = h - mean
    if mask is not None:
        centered = centered * mask
    var = jnp.sum(centered * centered, axis=-1, keepdims=True) * inv_n
    inv = jax.lax.rsqrt(var + EPS)
    return centered * inv * gamma + beta


def _residual_block_kernel(x_ref, w1_ref, w2_ref, p_ref, o_ref, *, n_hidden):
    # x_ref : (TB, Hp)  input dtype (f32 or bf16)
    # w*_ref: (Hp, Hp)  matmul dtype -- fed to the MXU as-is, f32 accumulation
    # p_ref : (8,  Hp)  f32 packed rows [b1, g1, be1, b2, g2, be2, lane_mask, 0]
    # o_ref : (TB, Hp)  output dtype == input dtype
    padded = x_ref.shape[-1] != n_hidden
    inv_n = 1.0 / n_hidden

    p = p_ref[...]
    b1, g1, be1 = p[0:1, :], p[1:2, :], p[2:3, :]
    b2, g2, be2 = p[3:4, :], p[4:5, :], p[5:6, :]
    mask = p[6:7, :] if padded else None

    # Linear 1 -> ReLU -> LayerNorm 1 (f32 accumulation via preferred_element_type).
    h = jnp.dot(x_ref[...].astype(w1_ref.dtype), w1_ref[...],
                preferred_element_type=jnp.float32) + b1
    h = jnp.maximum(h, 0.0)
    h = _layernorm(h, g1, be1, mask, inv_n)

    # Linear 2 -> ReLU -> LayerNorm 2.
    h = jnp.dot(h.astype(w2_ref.dtype), w2_ref[...],
                preferred_element_type=jnp.float32) + b2
    h = jnp.maximum(h, 0.0)
    h = _layernorm(h, g2, be2, mask, inv_n)

    # Residual add: re-read x here (short f32 live range) instead of keeping an
    # f32 copy of the whole tile alive across both matmuls.
    o_ref[...] = (x_ref[...].astype(jnp.float32) + h).astype(o_ref.dtype)


@functools.partial(jax.jit, static_argnames=("tb", "prefer_bf16_matmul"))
def residual_block(x, w1, b1, g1, be1, w2, b2, g2, be2, *, tb=256,
                   prefer_bf16_matmul=False):
    """Fused ResidualBlock forward.

    x: (B, H).  w1/w2: (H, H) stored as (in, out).  b*/g*/be*: (H,) or (1, H).
    Output: (B, H) in x.dtype.

    prefer_bf16_matmul=True casts f32 weights to bf16 in the wrapper (native MXU
    passes, half the weight VMEM); the default keeps PyTorch's promoted-dtype
    matmul semantics.
    """
    B, H = x.shape
    Hp = _round_up(H, _LANES)
    tb = _round_up(min(tb, _round_up(B, _SUBLANES)), _SUBLANES)
    Bp = _round_up(B, tb)
    # NOTE(v7x): with 2 TensorCores keep Bp // tb >= 2 for large B so the "parallel"
    # batch axis actually shards across cores (weights are duplicated per core).

    if prefer_bf16_matmul:
        mm_dtype = jnp.bfloat16
    else:
        # Promoted dtype: matches PyTorch mixed-precision convention (f32 x bf16 -> f32).
        mm_dtype = jnp.promote_types(x.dtype, jnp.promote_types(w1.dtype, w2.dtype))

    # Lane-dense zero padding.  Padded lanes stay exactly zero through both
    # Linear/ReLU/LayerNorm stages (zero weight cols/rows, zero bias/gamma/beta,
    # mask-by-multiply after centering) and are sliced off after the call.
    x_p = jnp.pad(x, ((0, Bp - B), (0, Hp - H)))
    w1_p = jnp.pad(w1.astype(mm_dtype), ((0, Hp - H), (0, Hp - H)))
    w2_p = jnp.pad(w2.astype(mm_dtype), ((0, Hp - H), (0, Hp - H)))

    def _vec(v):
        return jnp.pad(jnp.ravel(v).astype(jnp.float32), (0, Hp - H))

    lane_mask = (jnp.arange(Hp) < H).astype(jnp.float32)
    zeros = jnp.zeros((Hp,), jnp.float32)
    packed = jnp.stack([_vec(b1), _vec(g1), _vec(be1),
                        _vec(b2), _vec(g2), _vec(be2), lane_mask, zeros])

    # Grid-invariant parameter blocks: constant index_map -> never re-DMA'd, so a
    # single buffer suffices (halves resident weight VMEM vs the default 2 buffers).
    w_spec = pl.BlockSpec((Hp, Hp), lambda i: (0, 0), pipeline_mode=pl.Buffered(1))
    p_spec = pl.BlockSpec((8, Hp), lambda i: (0, 0), pipeline_mode=pl.Buffered(1))

    # Scoped-VMEM budget from the actual resident blocks, clamped to device VMEM.
    w_bytes = Hp * Hp * (w1_p.dtype.itemsize + w2_p.dtype.itemsize)   # single-buffered
    p_bytes = 8 * Hp * 4                                              # single-buffered
    io_bytes = 2 * tb * Hp * (x_p.dtype.itemsize + x.dtype.itemsize)  # x+out, double-buffered
    vmem_est = w_bytes + p_bytes + io_bytes
    device_vmem = _device_vmem_bytes()
    vmem_limit = int(max(min(vmem_est + (4 << 20), device_vmem - (4 << 20)), 8 << 20))

    cost = pl.CostEstimate(
        flops=2 * 2 * Bp * Hp * Hp,                 # two (Bp,Hp)x(Hp,Hp) matmuls
        transcendentals=2 * Bp,                     # one rsqrt per row per LayerNorm
        bytes_accessed=int(2 * Bp * Hp * x.dtype.itemsize + w_bytes + p_bytes),
    )

    out_p = pl.pallas_call(
        functools.partial(_residual_block_kernel, n_hidden=H),
        out_shape=jax.ShapeDtypeStruct((Bp, Hp), x.dtype),
        grid_spec=pltpu.PrefetchScalarGridSpec(
            num_scalar_prefetch=0,
            grid=(Bp // tb,),
            in_specs=[
                pl.BlockSpec((tb, Hp), lambda i: (i, 0)),   # x tile (pipelined)
                w_spec,                                     # W1 (resident, 1 buffer)
                w_spec,                                     # W2 (resident, 1 buffer)
                p_spec,                                     # packed b/gamma/beta/mask
            ],
            out_specs=pl.BlockSpec((tb, Hp), lambda i: (i, 0)),
        ),
        compiler_params=pltpu.CompilerParams(
            dimension_semantics=("parallel",),
            vmem_limit_bytes=vmem_limit,
        ),
        cost_estimate=cost,
    )(x_p, w1_p, w2_p, packed)

    return out_p[:B, :H]


def reference(x, w1, b1, g1, be1, w2, b2, g2, be2):
    def ln(h, g, b):
        m = jnp.mean(h, axis=-1, keepdims=True)
        v = jnp.mean((h - m) ** 2, axis=-1, keepdims=True)
        return (h - m) / jnp.sqrt(v + EPS) * jnp.ravel(g) + jnp.ravel(b)

    h = jnp.maximum(x @ w1 + jnp.ravel(b1), 0.0)
    h = ln(h, g1, be1)
    h = jnp.maximum(h @ w2 + jnp.ravel(b2), 0.0)
    h = ln(h, g2, be2)
    return x + h


if __name__ == "__main__":
    key = jax.random.PRNGKey(0)

    # ---- Config A: f32, H=32 (exercises the lane-padding / mask path) ----
    B, H = 16, 32
    kx, kw1, kb1, kw2, kb2 = jax.random.split(key, 5)
    x = jax.random.normal(kx, (B, H), dtype=jnp.float32)
    w1 = jax.random.normal(kw1, (H, H), dtype=jnp.float32) * 0.1
    b1 = jax.random.normal(kb1, (H,), dtype=jnp.float32) * 0.1
    w2 = jax.random.normal(kw2, (H, H), dtype=jnp.float32) * 0.1
    b2 = jax.random.normal(kb2, (H,), dtype=jnp.float32) * 0.1
    g1 = jnp.ones((H,), jnp.float32)
    be1 = jnp.zeros((H,), jnp.float32)
    g2 = jnp.ones((H,), jnp.float32)
    be2 = jnp.zeros((H,), jnp.float32)

    out = jax.block_until_ready(residual_block(x, w1, b1, g1, be1, w2, b2, g2, be2))
    ref = reference(x, w1, b1, g1, be1, w2, b2, g2, be2)
    assert out.shape == (B, H) and out.dtype == x.dtype
    assert jnp.allclose(out, ref, atol=1e-4, rtol=1e-4), "f32 mismatch vs reference"

    # ---- Config B: bf16 inputs + bf16 weights, lane-dense H=128 (no padding) ----
    B2, H2 = 32, 128
    k2 = jax.random.split(key, 6)
    x2 = jax.random.normal(k2[0], (B2, H2), dtype=jnp.float32).astype(jnp.bfloat16)
    w1b = (jax.random.normal(k2[1], (H2, H2), dtype=jnp.float32) * 0.05).astype(jnp.bfloat16)
    b1b = jax.random.normal(k2[2], (H2,), dtype=jnp.float32) * 0.05
    w2b = (jax.random.normal(k2[3], (H2, H2), dtype=jnp.float32) * 0.05).astype(jnp.bfloat16)
    b2b = jax.random.normal(k2[4], (H2,), dtype=jnp.float32) * 0.05
    g = jnp.ones((H2,), jnp.float32)
    be = jnp.zeros((H2,), jnp.float32)

    out2 = jax.block_until_ready(residual_block(x2, w1b, b1b, g, be, w2b, b2b, g, be))
    ref2 = reference(x2.astype(jnp.float32), w1b.astype(jnp.float32), b1b, g, be,
                     w2b.astype(jnp.float32), b2b, g, be)
    assert out2.shape == (B2, H2) and out2.dtype == jnp.bfloat16
    assert jnp.allclose(out2.astype(jnp.float32), ref2, atol=1e-1, rtol=1e-1), \
        "bf16 mismatch vs f32 reference"

    # ---- Config C: f32 inputs, opt-in bf16 weight cast (native MXU passes) ----
    B3, H3 = 24, 128
    k3 = jax.random.split(key, 5)
    x3 = jax.random.normal(k3[0], (B3, H3), dtype=jnp.float32)
    w13 = jax.random.normal(k3[1], (H3, H3), dtype=jnp.float32) * 0.05
    b13 = jax.random.normal(k3[2], (H3,), dtype=jnp.float32) * 0.05
    w23 = jax.random.normal(k3[3], (H3, H3), dtype=jnp.float32) * 0.05
    b23 = jax.random.normal(k3[4], (H3,), dtype=jnp.float32) * 0.05

    out3 = jax.block_until_ready(
        residual_block(x3, w13, b13, g, be, w23, b23, g, be, prefer_bf16_matmul=True))
    ref3 = reference(x3, w13, b13, g, be, w23, b23, g, be)
    assert out3.shape == (B3, H3) and out3.dtype == jnp.float32
    assert jnp.allclose(out3, ref3, atol=1e-1, rtol=1e-1), \
        "bf16-matmul opt-in mismatch vs f32 reference"

    print("KERNEL_OK")
</pallas_src>

<mosaic_0001>
module attributes {stable_mosaic.version = 11 : i64} {
  func.func @_residual_block_kernel(%arg0: i32, %arg1: memref<16x128xf32, #tpu.memory_space<vmem>>, %arg2: memref<128x128xf32, #tpu.memory_space<vmem>>, %arg3: memref<128x128xf32, #tpu.memory_space<vmem>>, %arg4: memref<8x128xf32, #tpu.memory_space<vmem>>, %arg5: memref<16x128xf32, #tpu.memory_space<vmem>>) attributes {dimension_semantics = [#tpu.dimension_semantics<parallel>], iteration_bounds = array<i64: 1>, scalar_prefetch = 0 : i64, scratch_operands = 0 : i64, tpu.core_type = #tpu.core_type<tc>, window_params = [{transform_indices = @transform_0, window_bounds = array<i64: 16, 128>}, {pipeline_mode = #tpu.pipeline_mode<synchronous>, transform_indices = @transform_1, window_bounds = array<i64: 128, 128>}, {pipeline_mode = #tpu.pipeline_mode<synchronous>, transform_indices = @transform_2, window_bounds = array<i64: 128, 128>}, {pipeline_mode = #tpu.pipeline_mode<synchronous>, transform_indices = @transform_3, window_bounds = array<i64: 8, 128>}, {transform_indices = @transform_4, window_bounds = array<i64: 16, 128>}]} {
    %c0 = arith.constant 0 : index
    %c0_0 = arith.constant 0 : index
    %0 = vector.load %arg4[%c0, %c0_0] : memref<8x128xf32, #tpu.memory_space<vmem>>, vector<8x128xf32>
    %1 = vector.extract_strided_slice %0 {offsets = [0, 0], sizes = [1, 128], strides = [1, 1]} : vector<8x128xf32> to vector<1x128xf32>
    %2 = vector.extract_strided_slice %0 {offsets = [1, 0], sizes = [1, 128], strides = [1, 1]} : vector<8x128xf32> to vector<1x128xf32>
    %3 = vector.extract_strided_slice %0 {offsets = [2, 0], sizes = [1, 128], strides = [1, 1]} : vector<8x128xf32> to vector<1x128xf32>
    %4 = vector.extract_strided_slice %0 {offsets = [3, 0], sizes = [1, 128], strides = [1, 1]} : vector<8x128xf32> to vector<1x128xf32>
    %5 = vector.extract_strided_slice %0 {offsets = [4, 0], sizes = [1, 128], strides = [1, 1]} : vector<8x128xf32> to vector<1x128xf32>
    %6 = vector.extract_strided_slice %0 {offsets = [5, 0], sizes = [1, 128], strides = [1, 1]} : vector<8x128xf32> to vector<1x128xf32>
    %7 = vector.extract_strided_slice %0 {offsets = [6, 0], sizes = [1, 128], strides = [1, 1]} : vector<8x128xf32> to vector<1x128xf32>
    %c0_1 = arith.constant 0 : index
    %c0_2 = arith.constant 0 : index
    %8 = vector.load %arg1[%c0_1, %c0_2] : memref<16x128xf32, #tpu.memory_space<vmem>>, vector<16x128xf32>
    %c0_3 = arith.constant 0 : index
    %c0_4 = arith.constant 0 : index
    %9 = vector.load %arg2[%c0_3, %c0_4] : memref<128x128xf32, #tpu.memory_space<vmem>>, vector<128x128xf32>
    %cst = arith.constant dense<0.000000e+00> : vector<16x128xf32>
    %10 = tpu.matmul %8, %9, %cst {dimension_numbers = #tpu.dot_dimension_numbers<[1], [0], [0], [1], [0, 0, 1, 1], [], []>} : vector<16x128xf32>, vector<128x128xf32>, vector<16x128xf32> -> vector<16x128xf32>
    %11 = vector.broadcast %1 : vector<1x128xf32> to vector<16x128xf32>
    %12 = arith.addf %10, %11 : vector<16x128xf32>
    %cst_5 = arith.constant 0.000000e+00 : f32
    %13 = vector.broadcast %cst_5 : f32 to vector<16x128xf32>
    %14 = arith.maximumf %12, %13 : vector<16x128xf32>
    %cst_6 = arith.constant dense<0.000000e+00> : vector<16xf32>
    %15 = vector.multi_reduction <add>, %14, %cst_6 [1] : vector<16x128xf32> to vector<16xf32>
    %16 = vector.shape_cast %15 : vector<16xf32> to vector<16x1xf32>
    %cst_7 = arith.constant 3.125000e-02 : f32
    %17 = vector.broadcast %cst_7 : f32 to vector<16x1xf32>
    %18 = arith.mulf %16, %17 : vector<16x1xf32>
    %19 = vector.broadcast %18 : vector<16x1xf32> to vector<16x128xf32>
    %20 = arith.subf %14, %19 : vector<16x128xf32>
    %21 = vector.broadcast %7 : vector<1x128xf32> to vector<16x128xf32>
    %22 = arith.mulf %20, %21 : vector<16x128xf32>
    %23 = arith.mulf %22, %22 : vector<16x128xf32>
    %cst_8 = arith.constant dense<0.000000e+00> : vector<16xf32>
    %24 = vector.multi_reduction <add>, %23, %cst_8 [1] : vector<16x128xf32> to vector<16xf32>
    %25 = vector.shape_cast %24 : vector<16xf32> to vector<16x1xf32>
    %cst_9 = arith.constant 3.125000e-02 : f32
    %26 = vector.broadcast %cst_9 : f32 to vector<16x1xf32>
    %27 = arith.mulf %25, %26 : vector<16x1xf32>
    %cst_10 = arith.constant 9.99999974E-6 : f32
    %28 = vector.broadcast %cst_10 : f32 to vector<16x1xf32>
    %29 = arith.addf %27, %28 : vector<16x1xf32>
    %30 = math.rsqrt %29 : vector<16x1xf32>
    %31 = vector.broadcast %30 : vector<16x1xf32> to vector<16x128xf32>
    %32 = arith.mulf %22, %31 : vector<16x128xf32>
    %33 = vector.broadcast %2 : vector<1x128xf32> to vector<16x128xf32>
    %34 = arith.mulf %32, %33 : vector<16x128xf32>
    %35 = vector.broadcast %3 : vector<1x128xf32> to vector<16x128xf32>
    %36 = arith.addf %34, %35 : vector<16x128xf32>
    %c0_11 = arith.constant 0 : index
    %c0_12 = arith.constant 0 : index
    %37 = vector.load %arg3[%c0_11, %c0_12] : memref<128x128xf32, #tpu.memory_space<vmem>>, vector<128x128xf32>
    %cst_13 = arith.constant dense<0.000000e+00> : vector<16x128xf32>
    %38 = tpu.matmul %36, %37, %cst_13 {dimension_numbers = #tpu.dot_dimension_numbers<[1], [0], [0], [1], [0, 0, 1, 1], [], []>} : vector<16x128xf32>, vector<128x128xf32>, vector<16x128xf32> -> vector<16x128xf32>
    %39 = vector.broadcast %4 : vector<1x128xf32> to vector<16x128xf32>
    %40 = arith.addf %38, %39 : vector<16x128xf32>
    %cst_14 = arith.constant 0.000000e+00 : f32
    %41 = vector.broadcast %cst_14 : f32 to vector<16x128xf32>
    %42 = arith.maximumf %40, %41 : vector<16x128xf32>
    %cst_15 = arith.constant dense<0.000000e+00> : vector<16xf32>
    %43 = vector.multi_reduction <add>, %42, %cst_15 [1] : vector<16x128xf32> to vector<16xf32>
    %44 = vector.shape_cast %43 : vector<16xf32> to vector<16x1xf32>
    %cst_16 = arith.constant 3.125000e-02 : f32
    %45 = vector.broadcast %cst_16 : f32 to vector<16x1xf32>
    %46 = arith.mulf %44, %45 : vector<16x1xf32>
    %47 = vector.broadcast %46 : vector<16x1xf32> to vector<16x128xf32>
    %48 = arith.subf %42, %47 : vector<16x128xf32>
    %49 = vector.broadcast %7 : vector<1x128xf32> to vector<16x128xf32>
    %50 = arith.mulf %48, %49 : vector<16x128xf32>
    %51 = arith.mulf %50, %50 : vector<16x128xf32>
    %cst_17 = arith.constant dense<0.000000e+00> : vector<16xf32>
    %52 = vector.multi_reduction <add>, %51, %cst_17 [1] : vector<16x128xf32> to vector<16xf32>
    %53 = vector.shape_cast %52 : vector<16xf32> to vector<16x1xf32>
    %cst_18 = arith.constant 3.125000e-02 : f32
    %54 = vector.broadcast %cst_18 : f32 to vector<16x1xf32>
    %55 = arith.mulf %53, %54 : vector<16x1xf32>
    %cst_19 = arith.constant 9.99999974E-6 : f32
    %56 = vector.broadcast %cst_19 : f32 to vector<16x1xf32>
    %57 = arith.addf %55, %56 : vector<16x1xf32>
    %58 = math.rsqrt %57 : vector<16x1xf32>
    %59 = vector.broadcast %58 : vector<16x1xf32> to vector<16x128xf32>
    %60 = arith.mulf %50, %59 : vector<16x128xf32>
    %61 = vector.broadcast %5 : vector<1x128xf32> to vector<16x128xf32>
    %62 = arith.mulf %60, %61 : vector<16x128xf32>
    %63 = vector.broadcast %6 : vector<1x128xf32> to vector<16x128xf32>
    %64 = arith.addf %62, %63 : vector<16x128xf32>
    %c0_20 = arith.constant 0 : index
    %c0_21 = arith.constant 0 : index
    %65 = vector.load %arg1[%c0_20, %c0_21] : memref<16x128xf32, #tpu.memory_space<vmem>>, vector<16x128xf32>
    %66 = arith.addf %65, %64 : vector<16x128xf32>
    %c0_22 = arith.constant 0 : index
    %c0_23 = arith.constant 0 : index
    %67 = vector.load %arg5[%c0_22, %c0_23] : memref<16x128xf32, #tpu.memory_space<vmem>>, vector<16x128xf32>
    tpu.vector_store %arg5[%c0_22, %c0_23], %66 {strides = array<i32>} : memref<16x128xf32, #tpu.memory_space<vmem>>, vector<16x128xf32>,
    return
  }
  func.func @transform_0(%arg0: i32) -> (i32, i32) {
    %c0_i32 = arith.constant 0 : i32
    %c0_i32_0 = arith.constant 0 : i32
    return %arg0, %c0_i32 : i32, i32
  }
  func.func @transform_1(%arg0: i32) -> (i32, i32) {
    %c0_i32 = arith.constant 0 : i32
    %c0_i32_0 = arith.constant 0 : i32
    %c0_i32_1 = arith.constant 0 : i32
    return %c0_i32, %c0_i32_0 : i32, i32
  }
  func.func @transform_2(%arg0: i32) -> (i32, i32) {
    %c0_i32 = arith.constant 0 : i32
    %c0_i32_0 = arith.constant 0 : i32
    %c0_i32_1 = arith.constant 0 : i32
    return %c0_i32, %c0_i32_0 : i32, i32
  }
  func.func @transform_3(%arg0: i32) -> (i32, i32) {
    %c0_i32 = arith.constant 0 : i32
    %c0_i32_0 = arith.constant 0 : i32
    %c0_i32_1 = arith.constant 0 : i32
    return %c0_i32, %c0_i32_0 : i32, i32
  }
  func.func @transform_4(%arg0: i32) -> (i32, i32) {
    %c0_i32 = arith.constant 0 : i32
    %c0_i32_0 = arith.constant 0 : i32
    return %arg0, %c0_i32 : i32, i32
  }
}

</mosaic_0001>

<bundles_post_ra>
// kernel: residual_block.1
= control target key start
LH: loop header
LB: loop body
LE: loop exit
PB: predicated region body
PF: predicated region fallthrough
CT: control target
= control target key end

     0   :  { %s462_s0 = inlined_call_operand.vmem [shape: f32[16,128], index: 0, kind: input, shape index: {}]   ;;  %s463_s1 = inlined_call_operand.vmem [shape: f32[128,128], index: 1, kind: input, shape index: {}]   ;;  %s464_s2 = inlined_call_operand.vmem [shape: f32[128,128], index: 2, kind: input, shape index: {}]   ;;  %s465_s3 = inlined_call_operand.vmem [shape: f32[8,128], index: 3, kind: input, shape index: {}]   ;;  %s466_s4 = inlined_call_operand.hbm [shape: f32[16,128], index: 4, kind: output, shape index: {}]  }
   0x1   :  { %v36_v0 = vld [vmem:[%s463_s1 + $0x78] sm:$0xff]  ;;  %v35_v1 = vld [vmem:[%s463_s1 + $0x70] sm:$0xff]  ;;  %v34_v2 = vld [vmem:[%s463_s1 + $0x68] sm:$0xff] }
   0x2   :  { %224 = vmatpush.msra.mxu2 %v36_v0  ;;  %38 = vmatpush.msra.mxu0 %v36_v0  ;;  %v33_v3 = vld [vmem:[%s463_s1 + $0x60] sm:$0xff]  ;;  %v32_v4 = vld [vmem:[%s463_s1 + $0x58] sm:$0xff] }
   0x4   :  { %225 = vmatpush.msra.mxu2 %v35_v1  ;;  %39 = vmatpush.msra.mxu0 %v35_v1 }
   0x6   :  { %226 = vmatpush.msra.mxu2 %v34_v2  ;;  %40 = vmatpush.msra.mxu0 %v34_v2 }
   0x7   :  { %9 = vsyncpa [#allocation3], 0  ;;  %v31_v5 = vld [vmem:[%s463_s1 + $0x50] sm:$0xff]  ;;  %v30_v6 = vld [vmem:[%s463_s1 + $0x48] sm:$0xff]  ;;  %s212_s30 = sshll.u32 %s466_s4, 4  ;;  %s294_s5 = smov 128   ;;  %s213_s30 = int_to_ptr.hbm [resolvable:$true] %s212_s30 }
   0x8   :  { %227 = vmatpush.msra.mxu2 %v33_v3  ;;  %41 = vmatpush.msra.mxu0 %v33_v3  ;;  %v29_v7 = vld [vmem:[%s463_s1 + $0x40] sm:$0xff]  ;;  %v28_v8 = vld [vmem:[%s463_s1 + $0x38] sm:$0xff]  ;;  %v27_v9 = vld [vmem:[%s463_s1 + $0x30] sm:$0xff]  ;;  %s295_s6 = smov 8  }
   0x9   :  { %v26_v10 = vld [vmem:[%s463_s1 + $0x28] sm:$0xff]  ;;  %v25_v11 = vld [vmem:[%s463_s1 + $0x20] sm:$0xff]  ;;  %v24_v12 = vld [vmem:[%s463_s1 + $0x18] sm:$0xff] }
   0xa   :  { %228 = vmatpush.msra.mxu2 %v32_v4  ;;  %42 = vmatpush.msra.mxu0 %v32_v4  ;;  %v23_v13 = vld [vmem:[%s463_s1 + $0x10] sm:$0xff]  ;;  %v22_v14 = vld [vmem:[%s463_s1 + $0x8] sm:$0xff]  ;;  %v21_v15 = vld [vmem:[%s463_s1] sm:$0xff] }
   0xb   :  { %v372_v16 = vld [vmem:[%s462_s0 + $0x8] sm:$0xff]  ;;  %v377_v17 = vld [vmem:[%s462_s0] sm:$0xff]  ;;  %v127_v26 = vld [vmem:[%s464_s2 + $0x78] sm:$0xff] }
   0xc   :  { %229 = vmatpush.msra.mxu2 %v31_v5  ;;  %43 = vmatpush.msra.mxu0 %v31_v5  ;;  %v384_v18 = vld [vmem:[%s465_s3] sm:$0xff]  ;;  %v126_v27 = vld [vmem:[%s464_s2 + $0x70] sm:$0xff]  ;;  %v125_v39 = vld [vmem:[%s464_s2 + $0x68] sm:$0xff] }
   0xd   :  { %v37_v19 = vperm.slane %v384_v18, 0  ;;  %240 = vmatpush.msra.mxu3 %v127_v26  ;;  %129 = vmatpush.msra.mxu1 %v127_v26  ;;  %v394_v30 = vperm.slane %v384_v18, 6  ;;  %v124_v40 = vld [vmem:[%s464_s2 + $0x60] sm:$0xff]  ;;  %v123_v41 = vld [vmem:[%s464_s2 + $0x58] sm:$0xff]  ;;  %v122_v42 = vld [vmem:[%s464_s2 + $0x50] sm:$0xff]  ;;  %v106_v3 = vperm.slane %v384_v18, 1 }
   0xe   :  { %230 = vmatpush.msra.mxu2 %v30_v6  ;;  %44 = vmatpush.msra.mxu0 %v30_v6  ;;  %v121_v43 = vld [vmem:[%s464_s2 + $0x48] sm:$0xff]  ;;  %v120_v44 = vld [vmem:[%s464_s2 + $0x40] sm:$0xff]  ;;  %v119_v45 = vld [vmem:[%s464_s2 + $0x38] sm:$0xff] }
   0xf   :  { %241 = vmatpush.msra.mxu3 %v126_v27  ;;  %130 = vmatpush.msra.mxu1 %v126_v27  ;;  %v118_v46 = vld [vmem:[%s464_s2 + $0x30] sm:$0xff]  ;;  %v117_v47 = vld [vmem:[%s464_s2 + $0x28] sm:$0xff]  ;;  %v116_v48 = vld [vmem:[%s464_s2 + $0x20] sm:$0xff] }
  0x10   :  { %231 = vmatpush.msra.mxu2 %v29_v7  ;;  %45 = vmatpush.msra.mxu0 %v29_v7  ;;  %v115_v49 = vld [vmem:[%s464_s2 + $0x18] sm:$0xff]  ;;  %v114_v50 = vld [vmem:[%s464_s2 + $0x10] sm:$0xff]  ;;  %v113_v51 = vld [vmem:[%s464_s2 + $0x8] sm:$0xff]  ;;  %v109_v7 = vperm.slane %v384_v18, 2 }
  0x11   :  { %242 = vmatpush.msra.mxu3 %v125_v39  ;;  %131 = vmatpush.msra.mxu1 %v125_v39  ;;  %v112_v52 = vld [vmem:[%s464_s2] sm:$0xff]  ;;  %s293_s2 = smov [#allocation2]  }
  0x12   :  { %232 = vmatpush.msra.mxu2 %v28_v8  ;;  %46 = vmatpush.msra.mxu0 %v28_v8  ;;  %s210_s28 = sshll.u32 %s293_s2, 4  ;;  %s211_s28 = int_to_ptr.vmem [resolvable:$true] %s210_s28 }
  0x13   :  { %243 = vmatpush.msra.mxu3 %v124_v40  ;;  %132 = vmatpush.msra.mxu1 %v124_v40 }
  0x14   :  { %233 = vmatpush.msra.mxu2 %v27_v9  ;;  %47 = vmatpush.msra.mxu0 %v27_v9 }
  0x15   :  { %244 = vmatpush.msra.mxu3 %v123_v41  ;;  %133 = vmatpush.msra.mxu1 %v123_v41 }
  0x16   :  { %234 = vmatpush.msra.mxu2 %v26_v10  ;;  %48 = vmatpush.msra.mxu0 %v26_v10 }
  0x17   :  { %245 = vmatpush.msra.mxu3 %v122_v42  ;;  %134 = vmatpush.msra.mxu1 %v122_v42 }
  0x18   :  { %235 = vmatpush.msra.mxu2 %v25_v11  ;;  %49 = vmatpush.msra.mxu0 %v25_v11 }
  0x19   :  { %246 = vmatpush.msra.mxu3 %v121_v43  ;;  %135 = vmatpush.msra.mxu1 %v121_v43 }
  0x1a   :  { %236 = vmatpush.msra.mxu2 %v24_v12  ;;  %50 = vmatpush.msra.mxu0 %v24_v12 }
  0x1b   :  { %247 = vmatpush.msra.mxu3 %v120_v44  ;;  %136 = vmatpush.msra.mxu1 %v120_v44 }
  0x1c   :  { %237 = vmatpush.msra.mxu2 %v23_v13  ;;  %51 = vmatpush.msra.mxu0 %v23_v13 }
  0x1d   :  { %248 = vmatpush.msra.mxu3 %v119_v45  ;;  %137 = vmatpush.msra.mxu1 %v119_v45 }
  0x1e   :  { %238 = vmatpush.msra.mxu2 %v22_v14  ;;  %52 = vmatpush.msra.mxu0 %v22_v14 }
  0x1f   :  { %249 = vmatpush.msra.mxu3 %v118_v46  ;;  %138 = vmatpush.msra.mxu1 %v118_v46 }
  0x20   :  { %239 = vmatpush.msra.mxu2 %v21_v15  ;;  %53 = vmatpush.msra.mxu0 %v21_v15 }
  0x21   :  { %57 = vmatmul.f32.vlgmr.msra.gmra.mxu2 %v372_v16  ;;  %54 = vmatmul.f32.vlgmr.msra.gmra.mxu0 %v377_v17 }
  0x22   :  { %250 = vmatpush.msra.mxu3 %v117_v47  ;;  %139 = vmatpush.msra.mxu1 %v117_v47 }
  0x24   :  { %251 = vmatpush.msra.mxu3 %v116_v48  ;;  %140 = vmatpush.msra.mxu1 %v116_v48 }
  0x26   :  { %252 = vmatpush.msra.mxu3 %v115_v49  ;;  %141 = vmatpush.msra.mxu1 %v115_v49 }
  0x28   :  { %253 = vmatpush.msra.mxu3 %v114_v50  ;;  %142 = vmatpush.msra.mxu1 %v114_v50 }
  0x2a   :  { %254 = vmatpush.msra.mxu3 %v113_v51  ;;  %143 = vmatpush.msra.mxu1 %v113_v51  ;;  %v196_v51 = vperm.slane %v384_v18, 4 }
  0x2c   :  { %255 = vmatpush.msra.mxu3 %v112_v52  ;;  %144 = vmatpush.msra.mxu1 %v112_v52 }
  0x9e   :  { %v55_v22 = vpop.f32.mrf.mxu0 }
  0x9f   :  { %v56_v24 = vadd.f32 %v55_v22, %v37_v19 }
  0xa1   :  { %v61_v25 = vmax.f32 %v56_v24, 0.0 }
  0xa4   :  { %v58_v20 = vpop.f32.mrf.mxu2 }
  0xa5   :  { %v59_v21 = vadd.f32 %v58_v20, %v37_v19  ;;  %v128_v20 = vperm.slane %v384_v18, 3 }
  0xa7   :  { %v62_v23 = vmax.f32 %v59_v21, 0.0 }
  0xa9   :  { %65 = vadd.xlane.f32.xlu0 %v62_v23 }
  0xb1   :  { %63 = vadd.xlane.f32.xlu0 %v61_v25 }
 0x11c   :  { %v66_v28 = vpop.xlane.xlu0 %65 }
 0x11d   :  { %v68_v29 = vmul.f32 0.03125, %v66_v28 }
 0x11f   :  { %v70_v31 = vsub.f32 %v62_v23, %v68_v29 }
 0x121   :  { %v397_v32 = vmul.f32 %v394_v30, %v70_v31 }
 0x123   :  { %v75_v33 = vmul.f32 %v397_v32, %v397_v32 }
 0x124   :  { %v64_v34 = vpop.xlane.xlu0 %63 }
 0x125   :  { %v67_v35 = vmul.f32 0.03125, %v64_v34  ;;  %78 = vadd.xlane.f32.xlu1 %v75_v33 }
 0x127   :  { %v69_v36 = vsub.f32 %v61_v25, %v67_v35 }
 0x129   :  { %v402_v37 = vmul.f32 %v394_v30, %v69_v36 }
 0x12b   :  { %v74_v38 = vmul.f32 %v402_v37, %v402_v37 }
 0x12d   :  { %76 = vadd.xlane.f32.xlu1 %v74_v38 }
 0x198   :  { %v79_v53 = vpop.xlane.xlu1 %78 }
 0x199   :  { %v81_v54 = vmul.f32 0.03125, %v79_v53 }
 0x19b   :  { %v83_v55 = vadd.f32 1e-05, %v81_v54  ;;  %v199_v54 = vperm.slane %v384_v18, 5 }
 0x19d   :  { %259 = vrsqrt.f32 %v83_v55  ;;  %vm100_vm1 = vweird.f32 %v83_v55 }
 0x1a0   :  { %v77_v56 = vpop.xlane.xlu1 %76 }
 0x1a1   :  { %v80_v57 = vmul.f32 0.03125, %v77_v56 }
 0x1a3   :  { %v260_v58 = vpop.eup %259  ;;  %v82_v59 = vadd.f32 1e-05, %v80_v57 }
 0x1a4   :  { %v95_v60 = vmul.f32 %v260_v58, %v83_v55  ;;  %vm101_vm0 = vweird.f32 %v260_v58 }
 0x1a5   :  { %261 = vrsqrt.f32 %v82_v59  ;;  %vm102_vm2 = vmor %vm100_vm1, %vm101_vm0  ;;  %vm90_vm4 = vweird.f32 %v82_v59 }
 0x1a6   :  { %v96_v61 = vmul.f32 %v260_v58, %v95_v60 }
 0x1a8   :  { %v97_v62 = vmul.f32 0.5, %v96_v61 }
 0x1aa   :  { %v98_v63 = vsub.f32 1.5, %v97_v62 }
 0x1ab   :  { %v262_v0 = vpop.eup %261 }
 0x1ac   :  { %v99_v1 = vmul.f32 %v260_v58, %v98_v63  ;;  %v85_v2 = vmul.f32 %v262_v0, %v82_v59  ;;  %vm91_vm3 = vweird.f32 %v262_v0 }
 0x1ad   :  { %vm92_vm5 = vmor %vm90_vm4, %vm91_vm3 }
 0x1ae   :  { %v86_v4 = vmul.f32 %v262_v0, %v85_v2  ;;  %v103_v5 = vsel %vm102_vm2, %v260_v58, %v99_v1 }
 0x1af   :  { %v105_v6 = vmul.f32 %v103_v5, %v397_v32 }
 0x1b0   :  { %v87_v8 = vmul.f32 0.5, %v86_v4 }
 0x1b1   :  { %v108_v9 = vmul.f32 %v106_v3, %v105_v6 }
 0x1b2   :  { %v88_v10 = vsub.f32 1.5, %v87_v8 }
 0x1b3   :  { %v111_v11 = vadd.f32 %v109_v7, %v108_v9 }
 0x1b4   :  { %v89_v12 = vmul.f32 %v262_v0, %v88_v10 }
 0x1b5   :  { %148 = vmatmul.f32.vlgmr.msra.gmra.mxu3 %v111_v11 }
 0x1b6   :  { %v93_v13 = vsel %vm92_vm5, %v262_v0, %v89_v12 }
 0x1b7   :  { %v104_v14 = vmul.f32 %v93_v13, %v402_v37 }
 0x1b9   :  { %v107_v15 = vmul.f32 %v106_v3, %v104_v14 }
 0x1bb   :  { %v110_v19 = vadd.f32 %v109_v7, %v107_v15 }
 0x1bd   :  { %145 = vmatmul.f32.vlgmr.msra.gmra.mxu1 %v110_v19 }
 0x238   :  { %v149_v24 = vpop.f32.mrf.mxu3 }
 0x239   :  { %v150_v25 = vadd.f32 %v149_v24, %v128_v20 }
 0x23a   :  { %v146_v21 = vpop.f32.mrf.mxu1 }
 0x23b   :  { %v147_v22 = vadd.f32 %v146_v21, %v128_v20  ;;  %v153_v26 = vmax.f32 %v150_v25, 0.0 }
 0x23d   :  { %v152_v23 = vmax.f32 %v147_v22, 0.0 }
 0x23f   :  { %154 = vadd.xlane.f32.xlu2 %v152_v23 }
 0x247   :  { %156 = vadd.xlane.f32.xlu2 %v153_v26 }
 0x2b2   :  { %v155_v27 = vpop.xlane.xlu2 %154 }
 0x2b3   :  { %v158_v28 = vmul.f32 0.03125, %v155_v27 }
 0x2b5   :  { %v160_v29 = vsub.f32 %v152_v23, %v158_v28 }
 0x2b7   :  { %v162_v31 = vmul.f32 %v160_v29, %v394_v30 }
 0x2b9   :  { %v164_v32 = vmul.f32 %v162_v31, %v162_v31 }
 0x2ba   :  { %v157_v33 = vpop.xlane.xlu2 %156 }
 0x2bb   :  { %v159_v34 = vmul.f32 0.03125, %v157_v33  ;;  %166 = vadd.xlane.f32.xlu0 %v164_v32 }
 0x2bd   :  { %v161_v35 = vsub.f32 %v153_v26, %v159_v34 }
 0x2bf   :  { %v163_v36 = vmul.f32 %v161_v35, %v394_v30 }
 0x2c1   :  { %v165_v37 = vmul.f32 %v163_v36, %v163_v36 }
 0x2c3   :  { %168 = vadd.xlane.f32.xlu1 %v165_v37 }
 0x32e   :  { %v167_v38 = vpop.xlane.xlu0 %166 }
 0x32f   :  { %v170_v39 = vmul.f32 0.03125, %v167_v38 }
 0x331   :  { %v172_v40 = vadd.f32 1e-05, %v170_v39 }
 0x333   :  { %263 = vrsqrt.f32 %v172_v40  ;;  %vm180_vm7 = vweird.f32 %v172_v40 }
 0x336   :  { %v169_v41 = vpop.xlane.xlu1 %168 }
 0x337   :  { %v171_v42 = vmul.f32 0.03125, %v169_v41 }
 0x339   :  { %v264_v43 = vpop.eup %263  ;;  %v173_v44 = vadd.f32 1e-05, %v171_v42 }
 0x33a   :  { %v175_v45 = vmul.f32 %v264_v43, %v172_v40  ;;  %vm181_vm6 = vweird.f32 %v264_v43 }
 0x33b   :  { %265 = vrsqrt.f32 %v173_v44  ;;  %vm182_vm8 = vmor %vm180_vm7, %vm181_vm6  ;;  %vm190_vm10 = vweird.f32 %v173_v44 }
 0x33c   :  { %v176_v46 = vmul.f32 %v264_v43, %v175_v45 }
 0x33e   :  { %v177_v47 = vmul.f32 0.5, %v176_v46 }
 0x340   :  { %v178_v48 = vsub.f32 1.5, %v177_v47 }
 0x341   :  { %v266_v49 = vpop.eup %265 }
 0x342   :  { %v179_v50 = vmul.f32 %v264_v43, %v178_v48  ;;  %v185_v30 = vmul.f32 %v266_v49, %v173_v44  ;;  %vm191_vm9 = vweird.f32 %v266_v49 }
 0x343   :  { %vm192_vm11 = vmor %vm190_vm10, %vm191_vm9 }
 0x344   :  { %v183_v52 = vsel %vm182_vm8, %v264_v43, %v179_v50  ;;  %v186_v53 = vmul.f32 %v266_v49, %v185_v30 }
 0x345   :  { %v194_v55 = vmul.f32 %v183_v52, %v162_v31 }
 0x346   :  { %v187_v56 = vmul.f32 0.5, %v186_v53 }
 0x347   :  { %v197_v57 = vmul.f32 %v196_v51, %v194_v55 }
 0x348   :  { %v188_v58 = vsub.f32 1.5, %v187_v56 }
 0x349   :  { %v200_v59 = vadd.f32 %v199_v54, %v197_v57 }
 0x34a   :  { %v189_v60 = vmul.f32 %v266_v49, %v188_v58 }
 0x34b   :  { %v202_v61 = vadd.f32 %v200_v59, %v377_v17 }
 0x34c   :  { %v193_v62 = vsel %vm192_vm11, %v266_v49, %v189_v60 }
 0x34d   :  { %v195_v63 = vmul.f32 %v193_v62, %v163_v36  ;;  %204 = vst [vmem:[#allocation2] sm:$0xff] %v202_v61 }
 0x34f   :  { %v198_v0 = vmul.f32 %v196_v51, %v195_v63 }
 0x351   :  { %v201_v18 = vadd.f32 %v199_v54, %v198_v0 }
 0x353   :  { %v203_v1 = vadd.f32 %v201_v18, %v372_v16 }
 0x355   :  { %205 = vst [vmem:[#allocation2 + $0x8] sm:$0xff] %v203_v1 }
 0x356   :  { %218 = dma.vmem_to_hbm [thread:$0]  %s211_s28, 256, %s213_s30, [#allocation3], %s294_s5, %s294_s5, %s295_s6  }
 0x357   :  { %291 = dma.done.wait [#allocation3], 256  }
 0x358   :  { %292 = vsyncadd [#allocation3], 4294967040 }
 0x359   :  { %223 = vsyncpa [#allocation3], 1 }

</bundles_post_ra>
